<compile_context>
chip_gen: v6e
topology: v6e:2x2x1
jax: 0.10.0
libtpu: 0.0.40
codegen_flags: <defaults>
</compile_context>

<pallas_src>
import functools

import jax
import jax.numpy as jnp
from jax import lax
from jax.experimental import pallas as pl
from jax.experimental.pallas import tpu as pltpu


# Target streamed input bytes (both logits arrays) per grid step.
_TARGET_INPUT_BYTES_PER_STEP = 4 * 1024 * 1024


def _sublane_rows(itemsize):
    # Native sublane packing: 8 rows for f32, 16 for bf16, 32 for int8/fp8.
    return max(8, 32 // max(int(itemsize), 1))


def _vmem_budget_and_limit():
    """Per-chip (sizing_budget, vmem_limit) in bytes, with headroom."""
    try:
        cap = int(pltpu.get_tpu_info().vmem_capacity_bytes)
    except Exception:
        cap = 64 * 1024 * 1024  # conservative (v7x-sized) fallback
    vmem_limit = max(cap - 16 * 1024 * 1024, 32 * 1024 * 1024)
    sizing_budget = max(cap - 32 * 1024 * 1024, 24 * 1024 * 1024)
    return sizing_budget, vmem_limit


def _choose_row_tile(n_rows, n_classes, in_itemsize, sizing_budget):
    """Row tile: big enough to amortize per-step overhead, small enough for VMEM."""
    sublane = _sublane_rows(in_itemsize)
    # VMEM bytes per row per step:
    #   inputs : 2 arrays x 2 pipeline buffers at the streaming itemsize
    #   compute: ~4 live (TB, C) f32 intermediates (upcasts, shifts, exp, prod)
    bytes_per_row = n_classes * (4 * in_itemsize + 4 * 4)
    tb_vmem = sizing_budget // max(bytes_per_row, 1)
    # ~4 MiB of streamed logits (2 arrays) per step.
    tb_target = _TARGET_INPUT_BYTES_PER_STEP // max(2 * n_classes * in_itemsize, 1)
    tb = min(tb_vmem, tb_target)
    tb = max(sublane, (tb // sublane) * sublane)
    rows_cap = -(-n_rows // sublane) * sublane  # don't tile beyond the batch
    # TODO(synk): for vocab-scale C where even a `sublane`-row full-C tile blows
    # VMEM, add a class-dim grid axis with online max/sum accumulators
    # (flash-softmax style) instead of relying on full-C row tiles.
    return min(tb, rows_cap)


def _kl_row_kernel(ys_ref, yt_ref, out_ref, *, inv_t, n_rows, block_rows):
    """Per-row KL sum_c p_t*(log p_t - log p_s) for one (TB, C) tile -> (TB, 1)."""
    # Row-validity mask for the ragged last tile. Masked rows get identical
    # zero student/teacher logits -> exactly 0 KL, and never hit exp/log on
    # unspecified padding data (which could otherwise poison the result).
    row0 = pl.program_id(0) * block_rows
    row_ids = row0 + lax.broadcasted_iota(jnp.int32, (block_rows, 1), 0)
    valid = row_ids < n_rows

    ys = jnp.where(valid, ys_ref[...].astype(jnp.float32), 0.0) * inv_t
    yt = jnp.where(valid, yt_ref[...].astype(jnp.float32), 0.0) * inv_t

    # Numerically stable shifted logits.
    ys_shift = ys - jnp.max(ys, axis=-1, keepdims=True)
    yt_shift = yt - jnp.max(yt, axis=-1, keepdims=True)

    z_s = jnp.sum(jnp.exp(ys_shift), axis=-1, keepdims=True)   # (TB, 1)
    exp_t = jnp.exp(yt_shift)                                   # (TB, C)
    z_t = jnp.sum(exp_t, axis=-1, keepdims=True)                # (TB, 1)

    # sum_c p_t*(log p_t - log p_s)
    #   = (1/z_t) * sum_c exp_t*(yt_shift - ys_shift) + (log z_s - log z_t)
    num = jnp.sum(exp_t * (yt_shift - ys_shift), axis=-1, keepdims=True)
    out_ref[...] = num / z_t + (jnp.log(z_s) - jnp.log(z_t))


def distill_kl(y_s, y_t, temperature, is_ca=False, *, block_rows=None):
    """JAX/Pallas equivalent of DistillKL(T).forward(y_s, y_t, is_ca)."""
    assert y_s.shape == y_t.shape and y_s.ndim == 2
    B, C = y_s.shape
    T = float(temperature)
    inv_t = 1.0 / T
    t2 = T * T

    in_itemsize = max(jnp.dtype(y_s.dtype).itemsize, jnp.dtype(y_t.dtype).itemsize)
    sublane = _sublane_rows(in_itemsize)
    rows_cap = -(-B // sublane) * sublane
    sizing_budget, vmem_limit = _vmem_budget_and_limit()

    if block_rows is None:
        tb = _choose_row_tile(B, C, in_itemsize, sizing_budget)
    else:
        tb = max(sublane, (int(block_rows) // sublane) * sublane)
        tb = min(tb, rows_cap)

    grid = (pl.cdiv(B, tb),)

    per_row = pl.pallas_call(
        functools.partial(_kl_row_kernel, inv_t=inv_t, n_rows=B, block_rows=tb),
        out_shape=jax.ShapeDtypeStruct((B, 1), jnp.float32),
        grid_spec=pl.GridSpec(
            grid=grid,
            in_specs=[
                pl.BlockSpec((tb, C), lambda i: (i, 0)),
                pl.BlockSpec((tb, C), lambda i: (i, 0)),
            ],
            out_specs=pl.BlockSpec((tb, 1), lambda i: (i, 0)),
        ),
        compiler_params=pltpu.CompilerParams(
            dimension_semantics=("parallel",),   # megacore-shardable on v7x
            vmem_limit_bytes=vmem_limit,
        ),
    )(y_s, y_t)

    if is_ca:
        # Per-sample losses: (KLDiv 'none' * T^2).sum(-1) -> [B]
        return per_row[:, 0] * t2
    # Batchmean: tiny wrapper-side reduction over the per-row partials.
    return jnp.sum(per_row) * (t2 / B)


def _reference(y_s, y_t, T):
    """Pure-JAX reference mirroring the PyTorch module."""
    p_s = jax.nn.log_softmax(y_s / T, axis=1)
    log_p_t = jax.nn.log_softmax(y_t / T, axis=1)
    p_t = jax.nn.softmax(y_t / T, axis=1)
    kl = p_t * (log_p_t - p_s)
    per_sample = kl.sum(-1) * T * T
    batchmean = kl.sum() / y_s.shape[0] * T * T
    return batchmean, per_sample


if __name__ == "__main__":
    key = jax.random.PRNGKey(0)
    k_s, k_t = jax.random.split(key)

    B, C = 8, 32          # batch of 8 samples, 32 classes
    T = 4.0               # distillation temperature

    y_s = jax.random.normal(k_s, (B, C), dtype=jnp.float32)
    y_t = jax.random.normal(k_t, (B, C), dtype=jnp.float32)

    loss_bm = jax.block_until_ready(distill_kl(y_s, y_t, T, is_ca=False))
    loss_ps = jax.block_until_ready(distill_kl(y_s, y_t, T, is_ca=True))

    ref_bm, ref_ps = _reference(y_s, y_t, T)
    assert loss_bm.shape == ()
    assert loss_ps.shape == (B,)
    assert jnp.allclose(loss_bm, ref_bm, rtol=2e-3, atol=1e-5), (loss_bm, ref_bm)
    assert jnp.allclose(loss_ps, ref_ps, rtol=2e-3, atol=1e-5), (loss_ps, ref_ps)
    assert jnp.allclose(loss_bm, jnp.mean(loss_ps), rtol=1e-5, atol=1e-6)

    # Ragged batch (B % tile != 0): exercises the in-kernel row mask (no jnp.pad),
    # both with the default single partial tile and a forced multi-step grid.
    B2 = 20
    y_s2 = jax.random.normal(jax.random.PRNGKey(1), (B2, C), dtype=jnp.float32)
    y_t2 = jax.random.normal(jax.random.PRNGKey(2), (B2, C), dtype=jnp.float32)
    ref2_bm, ref2_ps = _reference(y_s2, y_t2, T)
    for br in (None, 8):
        l_bm = jax.block_until_ready(distill_kl(y_s2, y_t2, T, is_ca=False, block_rows=br))
        l_ps = jax.block_until_ready(distill_kl(y_s2, y_t2, T, is_ca=True, block_rows=br))
        assert jnp.allclose(l_bm, ref2_bm, rtol=2e-3, atol=1e-5), (br, l_bm, ref2_bm)
        assert jnp.allclose(l_ps, ref2_ps, rtol=2e-3, atol=1e-5), (br, l_ps, ref2_ps)

    print("KERNEL_OK")
</pallas_src>

<mosaic_0001>
module attributes {stable_mosaic.version = 11 : i64} {
  func.func @_kl_row_kernel(%arg0: i32, %arg1: memref<8x32xf32, #tpu.memory_space<vmem>>, %arg2: memref<8x32xf32, #tpu.memory_space<vmem>>, %arg3: memref<8x1xf32, #tpu.memory_space<vmem>>) attributes {dimension_semantics = [#tpu.dimension_semantics<parallel>], iteration_bounds = array<i64: 1>, scalar_prefetch = 0 : i64, scratch_operands = 0 : i64, tpu.core_type = #tpu.core_type<tc>, window_params = [{transform_indices = @transform_0, window_bounds = array<i64: 8, 32>}, {transform_indices = @transform_1, window_bounds = array<i64: 8, 32>}, {transform_indices = @transform_2, window_bounds = array<i64: 8, 1>}]} {
    %c8_i32 = arith.constant 8 : i32
    %0 = arith.muli %arg0, %c8_i32 : i32
    %1 = tpu.iota {dimensions = array<i32: 0>} : vector<8x1xi32>
    %2 = vector.broadcast %0 : i32 to vector<8x1xi32>
    %3 = arith.addi %2, %1 : vector<8x1xi32>
    %c8_i32_0 = arith.constant 8 : i32
    %4 = vector.broadcast %c8_i32_0 : i32 to vector<8x1xi32>
    %5 = arith.cmpi slt, %3, %4 : vector<8x1xi32>
    %c0 = arith.constant 0 : index
    %c0_1 = arith.constant 0 : index
    %6 = vector.load %arg1[%c0, %c0_1] : memref<8x32xf32, #tpu.memory_space<vmem>>, vector<8x32xf32>
    %cst = arith.constant 0.000000e+00 : f32
    %7 = vector.shape_cast %5 : vector<8x1xi1> to vector<8x1xi1>
    %8 = vector.broadcast %7 : vector<8x1xi1> to vector<8x32xi1>
    %9 = vector.broadcast %cst : f32 to vector<8x32xf32>
    %10 = arith.select %8, %6, %9 : vector<8x32xi1>, vector<8x32xf32>
    %cst_2 = arith.constant 2.500000e-01 : f32
    %11 = vector.broadcast %cst_2 : f32 to vector<8x32xf32>
    %12 = arith.mulf %10, %11 : vector<8x32xf32>
    %c0_3 = arith.constant 0 : index
    %c0_4 = arith.constant 0 : index
    %13 = vector.load %arg2[%c0_3, %c0_4] : memref<8x32xf32, #tpu.memory_space<vmem>>, vector<8x32xf32>
    %cst_5 = arith.constant 0.000000e+00 : f32
    %14 = vector.shape_cast %5 : vector<8x1xi1> to vector<8x1xi1>
    %15 = vector.broadcast %14 : vector<8x1xi1> to vector<8x32xi1>
    %16 = vector.broadcast %cst_5 : f32 to vector<8x32xf32>
    %17 = arith.select %15, %13, %16 : vector<8x32xi1>, vector<8x32xf32>
    %cst_6 = arith.constant 2.500000e-01 : f32
    %18 = vector.broadcast %cst_6 : f32 to vector<8x32xf32>
    %19 = arith.mulf %17, %18 : vector<8x32xf32>
    %cst_7 = arith.constant dense<0xFF800000> : vector<8xf32>
    %20 = vector.multi_reduction <maximumf>, %12, %cst_7 [1] : vector<8x32xf32> to vector<8xf32>
    %21 = vector.shape_cast %20 : vector<8xf32> to vector<8x1xf32>
    %22 = vector.broadcast %21 : vector<8x1xf32> to vector<8x32xf32>
    %23 = arith.subf %12, %22 : vector<8x32xf32>
    %cst_8 = arith.constant dense<0xFF800000> : vector<8xf32>
    %24 = vector.multi_reduction <maximumf>, %19, %cst_8 [1] : vector<8x32xf32> to vector<8xf32>
    %25 = vector.shape_cast %24 : vector<8xf32> to vector<8x1xf32>
    %26 = vector.broadcast %25 : vector<8x1xf32> to vector<8x32xf32>
    %27 = arith.subf %19, %26 : vector<8x32xf32>
    %28 = math.exp %23 : vector<8x32xf32>
    %cst_9 = arith.constant dense<0.000000e+00> : vector<8xf32>
    %29 = vector.multi_reduction <add>, %28, %cst_9 [1] : vector<8x32xf32> to vector<8xf32>
    %30 = vector.shape_cast %29 : vector<8xf32> to vector<8x1xf32>
    %31 = math.exp %27 : vector<8x32xf32>
    %cst_10 = arith.constant dense<0.000000e+00> : vector<8xf32>
    %32 = vector.multi_reduction <add>, %31, %cst_10 [1] : vector<8x32xf32> to vector<8xf32>
    %33 = vector.shape_cast %32 : vector<8xf32> to vector<8x1xf32>
    %34 = arith.subf %27, %23 : vector<8x32xf32>
    %35 = arith.mulf %31, %34 : vector<8x32xf32>
    %cst_11 = arith.constant dense<0.000000e+00> : vector<8xf32>
    %36 = vector.multi_reduction <add>, %35, %cst_11 [1] : vector<8x32xf32> to vector<8xf32>
    %37 = vector.shape_cast %36 : vector<8xf32> to vector<8x1xf32>
    %38 = arith.divf %37, %33 : vector<8x1xf32>
    %39 = math.log %30 : vector<8x1xf32>
    %40 = math.log %33 : vector<8x1xf32>
    %41 = arith.subf %39, %40 : vector<8x1xf32>
    %42 = arith.addf %38, %41 : vector<8x1xf32>
    %c0_12 = arith.constant 0 : index
    %c0_13 = arith.constant 0 : index
    %43 = vector.load %arg3[%c0_12, %c0_13] : memref<8x1xf32, #tpu.memory_space<vmem>>, vector<8x1xf32>
    tpu.vector_store %arg3[%c0_12, %c0_13], %42 {strides = array<i32>} : memref<8x1xf32, #tpu.memory_space<vmem>>, vector<8x1xf32>,
    return
  }
  func.func @transform_0(%arg0: i32) -> (i32, i32) {
    %c0_i32 = arith.constant 0 : i32
    %c0_i32_0 = arith.constant 0 : i32
    return %arg0, %c0_i32 : i32, i32
  }
  func.func @transform_1(%arg0: i32) -> (i32, i32) {
    %c0_i32 = arith.constant 0 : i32
    %c0_i32_0 = arith.constant 0 : i32
    return %arg0, %c0_i32 : i32, i32
  }
  func.func @transform_2(%arg0: i32) -> (i32, i32) {
    %c0_i32 = arith.constant 0 : i32
    %c0_i32_0 = arith.constant 0 : i32
    return %arg0, %c0_i32 : i32, i32
  }
}

</mosaic_0001>

<bundles_post_ra>
// kernel: tpu_custom_call.1
= control target key start
LH: loop header
LB: loop body
LE: loop exit
PB: predicated region body
PF: predicated region fallthrough
CT: control target
= control target key end

     0   :  { %7 = vsyncpa [#allocation3], 0  ;;  %s176_s0 = inlined_call_operand.hbm [shape: f32[8,32], index: 0, kind: input, shape index: {}]   ;;  %s177_s1 = inlined_call_operand.hbm [shape: f32[8,32], index: 1, kind: input, shape index: {}]   ;;  %s178_s2 = inlined_call_operand.vmem [shape: f32[8,1], index: 2, kind: output, shape index: {}]  }
   0x1   :  { %8 = vsyncpa [#allocation5], 0  ;;  %s145_s9 = smov [#allocation2]   ;;  %s146_s11 = smov [#allocation4]  }
   0x2   :  { %s15_s10 = sshll.u32 %s145_s9, 4  ;;  %s25_s12 = sshll.u32 %s146_s11, 4  ;;  %s16_s10 = int_to_ptr.vmem [resolvable:$true] %s15_s10  ;;  %s26_s12 = int_to_ptr.vmem [resolvable:$true] %s25_s12 }
   0x3   :  { %s109_s13 = scalar_lea.vmem %s16_s10, 128  ;;  %p114_p1 = scmp.lt.s32.totalorder %s16_s10, %s16_s10 }
   0x4   :  { %p110_p0 = scmp.ne.s32.totalorder %s16_s10, %s109_s13  ;;  %p115_p2 = scmp.lt.s32.totalorder %s109_s13, %s109_s13 }
   0x6   :  { %p116_p3 = por %p115_p2, %p114_p1 }
   0x8   :  { %p117_p4 = pnand %p116_p3, %p110_p0 }
   0xa   :  { %120 = shalt.err (!%p117_p4)
}
   0xb   :  { %18 = dma.hbm_to_vmem [thread:$0]  %s176_s0, 128, %s16_s10, [#allocation3]  }
   0xc   :  { %s129_s16 = scalar_lea.vmem %s26_s12, 128  ;;  %p134_p6 = scmp.lt.s32.totalorder %s26_s12, %s26_s12 }
   0xd   :  { %p130_p5 = scmp.ne.s32.totalorder %s26_s12, %s129_s16  ;;  %p135_p7 = scmp.lt.s32.totalorder %s129_s16, %s129_s16 }
   0xf   :  { %p136_p8 = por %p135_p7, %p134_p6 }
  0x11   :  { %p137_p9 = pnand %p136_p8, %p130_p5 }
  0x13   :  { %140 = shalt.err (!%p137_p9)
}
  0x14   :  { %28 = dma.hbm_to_vmem [thread:$0]  %s177_s1, 128, %s26_s12, [#allocation5]  }
  0x15   :  { %141 = dma.done.wait [#allocation3], 128  }
  0x16   :  { %142 = vsyncadd [#allocation3], 4294967168 }
  0x17   :  { %143 = dma.done.wait [#allocation5], 128  }
  0x18   :  { %144 = vsyncadd [#allocation5], 4294967168  ;;  %v41_v0 = vld [vmem:[#allocation2] sm:$0xff]  ;;  %vm49_vm0 = vcmask 261120   ;;  %v46_v1 = vld [vmem:[#allocation4] sm:$0xff]  ;;  %vm81_vm1 = vcmask 7168  }
  0x19   :  { %v45_v2 = vmul.f32 0.25, %v41_v0  ;;  %v48_v3 = vmul.f32 0.25, %v46_v1 }
  0x1b   :  { %v50_v4 = vsel %vm49_vm0, %v45_v2, -inf  ;;  %v54_v5 = vsel %vm49_vm0, %v48_v3, -inf }
  0x1c   :  { %51 = vmax.xlane.f32.xlu0 %v50_v4 }
  0x20   :  { %55 = vmax.xlane.f32.xlu0 %v54_v5 }
  0xa5   :  { %v52_v6 = vpop.xlane.xlu0 %51 }
  0xa6   :  { %v53_v7 = vsub.f32 %v45_v2, %v52_v6 }
  0xa8   :  { %v58_v8 = vmul.f32 1.442695, %v53_v7 }
  0xa9   :  { %v56_v9 = vpop.xlane.xlu0 %55 }
  0xaa   :  { %91 = vpow2.f32 %v58_v8  ;;  %v57_v10 = vsub.f32 %v48_v3, %v56_v9 }
  0xac   :  { %v63_v11 = vmul.f32 1.442695, %v57_v10  ;;  %v68_v14 = vsub.f32 %v57_v10, %v53_v7 }
  0xae   :  { %93 = vpow2.f32 %v63_v11 }
  0xb7   :  { %v92_v12 = vpop.eup %91 }
  0xb8   :  { %v60_v13 = vsel %vm49_vm0, %v92_v12, 0.0 }
  0xb9   :  { %61 = vadd.xlane.f32.xlu1 %v60_v13 }
  0xbb   :  { %v94_v15 = vpop.eup %93 }
  0xbc   :  { %v65_v16 = vsel %vm49_vm0, %v94_v15, 0.0  ;;  %v69_v17 = vmul.f32 %v94_v15, %v68_v14 }
  0xbd   :  { %66 = vadd.xlane.f32.xlu1 %v65_v16 }
  0xbe   :  { %v70_v18 = vsel %vm49_vm0, %v69_v17, 0.0 }
  0xbf   :  { %71 = vadd.xlane.f32.xlu0 %v70_v18 }
 0x142   :  { %v62_v19 = vpop.xlane.xlu1 %61 }
 0x143   :  { %95 = vlog2.f32 %v62_v19 }
 0x146   :  { %v67_v20 = vpop.xlane.xlu1 %66 }
 0x147   :  { %97 = vrcp.f32 %v67_v20 }
 0x148   :  { %99 = vlog2.f32 %v67_v20  ;;  %v72_v26 = vpop.xlane.xlu0 %71 }
 0x150   :  { %v96_v21 = vpop.eup %95 }
 0x151   :  { %v76_v24 = vmul.f32 0.6931472, %v96_v21 }
 0x154   :  { %v98_v22 = vpop.eup %97 }
 0x155   :  { %v100_v23 = vpop.eup %99  ;;  %v74_v27 = vmul.f32 %v98_v22, %v72_v26 }
 0x156   :  { %v78_v25 = vmul.f32 0.6931472, %v100_v23 }
 0x158   :  { %v79_v28 = vsub.f32 %v76_v24, %v78_v25 }
 0x15a   :  { %v80_v29 = vadd.f32 %v79_v28, %v74_v27 }
 0x15c   :  { %82 = vst.msk [vmem:[%s178_s2] sm:$0xff] %vm81_vm1, %v80_v29 }
 0x15d   :  { %87 = vsyncpa [#allocation3], 1 }
 0x15e   :  { %88 = vsyncpa [#allocation5], 1 }

</bundles_post_ra>
